<compile_context>
chip_gen: v7x
topology: tpu7x:2x2x1
jax: 0.10.0
libtpu: 0.0.40
codegen_flags: <defaults>
</compile_context>

<pallas_src>
import jax
import jax.numpy as jnp
import numpy as np
from jax.experimental import pallas as pl
from jax.experimental.pallas import tpu as pltpu

# --- fixed (non-learnable) kernel-pooling constants from __init__ ---
MU_LIST = [1.0, 0.9, 0.7, 0.5, 0.3, 0.1, -0.1, -0.3, -0.5, -0.7, -0.9]
SIGMA_LIST = [0.001] + [0.1] * 10
N_BINS = len(MU_LIST)
# Precomputed per-bin exponent coefficients: -1 / (2 * sigma^2) (compile-time scalars)
NEG_HALF_INV_SIGMA2 = [float(-1.0 / (2.0 * s * s)) for s in SIGMA_LIST]
LOG_SCALE = 0.01
ACC_LANES = 128        # lane-dense accumulator / output width; bins live in lanes [0, N_BINS)
MASK_SENTINEL = 3.0    # |3.0 - mu| >= 2.1 -> exponent <= -220.5 -> exp underflows to exactly 0 (f32)

# kept only for the pure-JAX reference (PyTorch-structure transcription)
MU = jnp.array(MU_LIST, dtype=jnp.float32)
SIGMA = jnp.array(SIGMA_LIST, dtype=jnp.float32)


def _kernel_pooling_kernel(mat_ref, mrow_ref, mcol_ref, out_ref, acc_ref):
    # mat_ref : (Bb, row, col_t)     similarity tile, col on the lane axis
    # mrow_ref: (Bb, row, 1)         query-side mask
    # mcol_ref: (Bb, 1, col_t)       document-side mask, lane-major
    # out_ref : (Bb, 1, ACC_LANES)   lane-dense output (bins in lanes [0, N_BINS))
    # acc_ref : (Bb, row, ACC_LANES) pooling_sum accumulator across col tiles
    ci = pl.program_id(1)

    @pl.when(ci == 0)
    def _init():
        acc_ref[...] = jnp.zeros_like(acc_ref)

    # One-time mask fold (hoisted out of the bin loop). Masked / padded columns
    # get the sentinel, whose Gaussian value is exactly 0.0 in f32 for every bin,
    # matching the reference's multiply-by-mask_col semantics exactly.
    m = jnp.where(mcol_ref[...] > 0.0, mat_ref[...], MASK_SENTINEL)     # (Bb, row, col_t)

    per_bin = []
    for b in range(N_BINS):
        d = m - MU_LIST[b]
        e = jnp.exp((d * d) * NEG_HALF_INV_SIGMA2[b])                   # EUP, full lane occupancy
        per_bin.append(jnp.sum(e, axis=-1, keepdims=True))              # XLU lane reduce -> (Bb,row,1)

    bb, r, _ = acc_ref.shape
    pad = jnp.zeros((bb, r, ACC_LANES - N_BINS), jnp.float32)
    acc_ref[...] += jnp.concatenate(per_bin + [pad], axis=-1)           # unmasked lane-dense RMW

    @pl.when(ci == pl.num_programs(1) - 1)
    def _finalize():
        mrow = mrow_ref[...]                                            # (Bb, row, 1)
        lp = jnp.log(jnp.maximum(acc_ref[...], 1e-10)) * LOG_SCALE * mrow
        out_ref[...] = jnp.sum(lp, axis=1, keepdims=True)               # (Bb, 1, ACC_LANES)


def _largest_divisor_leq(n, cap):
    cap = max(1, min(n, cap))
    for d in range(cap, 0, -1):
        if n % d == 0:
            return d
    return 1


def kernel_pooling(matrix, mask_row, mask_col):
    """matrix: (B, row, col) f32; mask_row: (B, row); mask_col: (B, col) -> (B, n_bins)."""
    B, row, col = matrix.shape
    matrix = matrix.astype(jnp.float32)
    mrow = mask_row.astype(jnp.float32).reshape(B, row, 1)
    mcol = mask_col.astype(jnp.float32).reshape(B, 1, col)               # lane-major mask

    # --- VMEM-aware sizing (v5e/v6e: 128 MiB, v7x: 64 MiB; conservative fallback) ---
    try:
        vmem_cap = int(pltpu.get_tpu_info().vmem_capacity_bytes)
    except Exception:
        vmem_cap = 64 << 20
    vmem_limit = int(min(vmem_cap * 3 // 4, 96 << 20))

    # Lane-dense col tile; pad col up so every block is (8,128)-aligned and unmasked.
    col_pad_to_lane = ((col + 127) // 128) * 128
    col_t = 128
    for cand in (1024, 512, 256, 128):
        if cand <= col_pad_to_lane:
            col_t = cand
            break
    col_pad = ((col_pad_to_lane + col_t - 1) // col_t) * col_t
    if col_pad != col:
        matrix = jnp.pad(matrix, ((0, 0), (0, 0), (0, col_pad - col)))
        mcol = jnp.pad(mcol, ((0, 0), (0, 0), (0, col_pad - col)))       # padding mask = 0 -> contributes 0

    # Batch block: big enough to amortize ~0.35 us/step overhead, small enough for VMEM
    # (main input block double-buffered), and >= 2 batch grid steps when B >= 2 so the
    # "parallel" batch axis can span both v7x TensorCores.
    blk_budget = min(16 << 20, vmem_limit // 6)
    bytes_per_batch = row * col_t * 4
    cap = max(1, blk_budget // max(1, bytes_per_batch))
    if B >= 2:
        cap = min(cap, B // 2)
    Bb = _largest_divisor_leq(B, cap)

    grid = (B // Bb, col_pad // col_t)

    out = pl.pallas_call(
        _kernel_pooling_kernel,
        out_shape=jax.ShapeDtypeStruct((B, 1, ACC_LANES), jnp.float32),
        grid_spec=pltpu.PrefetchScalarGridSpec(
            num_scalar_prefetch=0,
            grid=grid,
            in_specs=[
                pl.BlockSpec((Bb, row, col_t), lambda b, c: (b, 0, c)),
                pl.BlockSpec((Bb, row, 1), lambda b, c: (b, 0, 0)),
                pl.BlockSpec((Bb, 1, col_t), lambda b, c: (b, 0, c)),
            ],
            out_specs=pl.BlockSpec((Bb, 1, ACC_LANES), lambda b, c: (b, 0, 0)),
            scratch_shapes=[pltpu.VMEM((Bb, row, ACC_LANES), jnp.float32)],
        ),
        compiler_params=pltpu.CompilerParams(
            dimension_semantics=("parallel", "arbitrary"),
            vmem_limit_bytes=vmem_limit,
        ),
    )(matrix, mrow, mcol)
    return out.reshape(B, ACC_LANES)[:, :N_BINS]


def kernel_pooling_reference(matrix, mask_row, mask_col):
    """Pure-JAX transcription of the PyTorch forward (matrix has implicit trailing 1)."""
    mu = MU.reshape(1, 1, 1, N_BINS)
    sigma = SIGMA.reshape(1, 1, 1, N_BINS)
    m = matrix[..., None]                                           # (B,row,col,1)
    pooling_value = jnp.exp(-(m - mu) ** 2 / sigma ** 2 / 2.0)
    pooling_value = pooling_value * mask_col[:, None, :, None]      # (B,1,col,1)
    pooling_sum = jnp.sum(pooling_value, axis=-2)                   # (B,row,n_bins)
    log_pooling = jnp.log(jnp.maximum(pooling_sum, 1e-10)) * 0.01
    log_pooling = log_pooling * mask_row[..., None]                 # (B,row,1)
    return jnp.sum(log_pooling, axis=-2)                            # (B,n_bins)


if __name__ == "__main__":
    key = jax.random.PRNGKey(0)
    k1, k2, k3 = jax.random.split(key, 3)

    B, row, col = 2, 8, 16  # small shapes: batch=2, query_len=8, doc_len=16
    # similarity matrix in [-1, 1] (cosine-sim style)
    matrix = jax.random.uniform(k1, (B, row, col), jnp.float32, minval=-1.0, maxval=1.0)
    mask_row = (jax.random.uniform(k2, (B, row)) > 0.2).astype(jnp.float32)
    mask_col = (jax.random.uniform(k3, (B, col)) > 0.2).astype(jnp.float32)

    out = kernel_pooling(matrix, mask_row, mask_col)
    jax.block_until_ready(out)

    ref = kernel_pooling_reference(matrix, mask_row, mask_col)
    assert out.shape == (B, N_BINS)
    np.testing.assert_allclose(np.asarray(out), np.asarray(ref), rtol=1e-5, atol=1e-5)

    print("KERNEL_OK")
</pallas_src>

<mosaic_0001>
module attributes {stable_mosaic.version = 11 : i64} {
  func.func @_kernel_pooling_kernel(%arg0: i32, %arg1: i32, %arg2: memref<1x8x128xf32, #tpu.memory_space<vmem>>, %arg3: memref<1x8x1xf32, #tpu.memory_space<vmem>>, %arg4: memref<1x1x128xf32, #tpu.memory_space<vmem>>, %arg5: memref<1x1x128xf32, #tpu.memory_space<vmem>>, %arg6: memref<1x8x128xf32, #tpu.memory_space<vmem>>) attributes {dimension_semantics = [#tpu.dimension_semantics<parallel>, #tpu.dimension_semantics<arbitrary>], iteration_bounds = array<i64: 2, 1>, scalar_prefetch = 0 : i64, scratch_operands = 1 : i64, tpu.core_type = #tpu.core_type<tc>, window_params = [{transform_indices = @transform_0, window_bounds = array<i64: 1, 8, 128>}, {transform_indices = @transform_1, window_bounds = array<i64: 1, 8, 1>}, {transform_indices = @transform_2, window_bounds = array<i64: 1, 1, 128>}, {transform_indices = @transform_3, window_bounds = array<i64: 1, 1, 128>}]} {
    %c0_i32 = arith.constant 0 : i32
    %0 = arith.cmpi eq, %arg1, %c0_i32 : i32
    %1 = arith.extui %0 : i1 to i32
    %c0_i32_0 = arith.constant 0 : i32
    %2 = arith.cmpi ne, %1, %c0_i32_0 : i32
    scf.if %2 {
      %cst_49 = arith.constant 0.000000e+00 : f32
      %107 = vector.broadcast %cst_49 : f32 to vector<1x8x128xf32>
      %c0_50 = arith.constant 0 : index
      %c0_51 = arith.constant 0 : index
      %c0_52 = arith.constant 0 : index
      %108 = vector.load %arg6[%c0_50, %c0_51, %c0_52] : memref<1x8x128xf32, #tpu.memory_space<vmem>>, vector<1x8x128xf32>
      tpu.vector_store %arg6[%c0_50, %c0_51, %c0_52], %107 {strides = array<i32>} : memref<1x8x128xf32, #tpu.memory_space<vmem>>, vector<1x8x128xf32>,
    } else {
    }
    %c0 = arith.constant 0 : index
    %c0_1 = arith.constant 0 : index
    %c0_2 = arith.constant 0 : index
    %3 = vector.load %arg4[%c0, %c0_1, %c0_2] : memref<1x1x128xf32, #tpu.memory_space<vmem>>, vector<1x1x128xf32>
    %cst = arith.constant 0.000000e+00 : f32
    %4 = vector.broadcast %cst : f32 to vector<1x1x128xf32>
    %5 = arith.cmpf ogt, %3, %4 : vector<1x1x128xf32>
    %c0_3 = arith.constant 0 : index
    %c0_4 = arith.constant 0 : index
    %c0_5 = arith.constant 0 : index
    %6 = vector.load %arg2[%c0_3, %c0_4, %c0_5] : memref<1x8x128xf32, #tpu.memory_space<vmem>>, vector<1x8x128xf32>
    %cst_6 = arith.constant 3.000000e+00 : f32
    %7 = vector.shape_cast %5 : vector<1x1x128xi1> to vector<1x1x128xi1>
    %8 = vector.broadcast %7 : vector<1x1x128xi1> to vector<1x8x128xi1>
    %9 = vector.broadcast %cst_6 : f32 to vector<1x8x128xf32>
    %10 = arith.select %8, %6, %9 : vector<1x8x128xi1>, vector<1x8x128xf32>
    %cst_7 = arith.constant 1.000000e+00 : f32
    %11 = vector.broadcast %cst_7 : f32 to vector<1x8x128xf32>
    %12 = arith.subf %10, %11 : vector<1x8x128xf32>
    %13 = arith.mulf %12, %12 : vector<1x8x128xf32>
    %cst_8 = arith.constant -5.000000e+05 : f32
    %14 = vector.broadcast %cst_8 : f32 to vector<1x8x128xf32>
    %15 = arith.mulf %13, %14 : vector<1x8x128xf32>
    %16 = math.exp %15 : vector<1x8x128xf32>
    %cst_9 = arith.constant dense<0.000000e+00> : vector<1x8xf32>
    %17 = vector.multi_reduction <add>, %16, %cst_9 [2] : vector<1x8x128xf32> to vector<1x8xf32>
    %18 = vector.shape_cast %17 : vector<1x8xf32> to vector<1x8x1xf32>
    %cst_10 = arith.constant 0.899999976 : f32
    %19 = vector.broadcast %cst_10 : f32 to vector<1x8x128xf32>
    %20 = arith.subf %10, %19 : vector<1x8x128xf32>
    %21 = arith.mulf %20, %20 : vector<1x8x128xf32>
    %cst_11 = arith.constant -5.000000e+01 : f32
    %22 = vector.broadcast %cst_11 : f32 to vector<1x8x128xf32>
    %23 = arith.mulf %21, %22 : vector<1x8x128xf32>
    %24 = math.exp %23 : vector<1x8x128xf32>
    %cst_12 = arith.constant dense<0.000000e+00> : vector<1x8xf32>
    %25 = vector.multi_reduction <add>, %24, %cst_12 [2] : vector<1x8x128xf32> to vector<1x8xf32>
    %26 = vector.shape_cast %25 : vector<1x8xf32> to vector<1x8x1xf32>
    %cst_13 = arith.constant 0.699999988 : f32
    %27 = vector.broadcast %cst_13 : f32 to vector<1x8x128xf32>
    %28 = arith.subf %10, %27 : vector<1x8x128xf32>
    %29 = arith.mulf %28, %28 : vector<1x8x128xf32>
    %cst_14 = arith.constant -5.000000e+01 : f32
    %30 = vector.broadcast %cst_14 : f32 to vector<1x8x128xf32>
    %31 = arith.mulf %29, %30 : vector<1x8x128xf32>
    %32 = math.exp %31 : vector<1x8x128xf32>
    %cst_15 = arith.constant dense<0.000000e+00> : vector<1x8xf32>
    %33 = vector.multi_reduction <add>, %32, %cst_15 [2] : vector<1x8x128xf32> to vector<1x8xf32>
    %34 = vector.shape_cast %33 : vector<1x8xf32> to vector<1x8x1xf32>
    %cst_16 = arith.constant 5.000000e-01 : f32
    %35 = vector.broadcast %cst_16 : f32 to vector<1x8x128xf32>
    %36 = arith.subf %10, %35 : vector<1x8x128xf32>
    %37 = arith.mulf %36, %36 : vector<1x8x128xf32>
    %cst_17 = arith.constant -5.000000e+01 : f32
    %38 = vector.broadcast %cst_17 : f32 to vector<1x8x128xf32>
    %39 = arith.mulf %37, %38 : vector<1x8x128xf32>
    %40 = math.exp %39 : vector<1x8x128xf32>
    %cst_18 = arith.constant dense<0.000000e+00> : vector<1x8xf32>
    %41 = vector.multi_reduction <add>, %40, %cst_18 [2] : vector<1x8x128xf32> to vector<1x8xf32>
    %42 = vector.shape_cast %41 : vector<1x8xf32> to vector<1x8x1xf32>
    %cst_19 = arith.constant 3.000000e-01 : f32
    %43 = vector.broadcast %cst_19 : f32 to vector<1x8x128xf32>
    %44 = arith.subf %10, %43 : vector<1x8x128xf32>
    %45 = arith.mulf %44, %44 : vector<1x8x128xf32>
    %cst_20 = arith.constant -5.000000e+01 : f32
    %46 = vector.broadcast %cst_20 : f32 to vector<1x8x128xf32>
    %47 = arith.mulf %45, %46 : vector<1x8x128xf32>
    %48 = math.exp %47 : vector<1x8x128xf32>
    %cst_21 = arith.constant dense<0.000000e+00> : vector<1x8xf32>
    %49 = vector.multi_reduction <add>, %48, %cst_21 [2] : vector<1x8x128xf32> to vector<1x8xf32>
    %50 = vector.shape_cast %49 : vector<1x8xf32> to vector<1x8x1xf32>
    %cst_22 = arith.constant 1.000000e-01 : f32
    %51 = vector.broadcast %cst_22 : f32 to vector<1x8x128xf32>
    %52 = arith.subf %10, %51 : vector<1x8x128xf32>
    %53 = arith.mulf %52, %52 : vector<1x8x128xf32>
    %cst_23 = arith.constant -5.000000e+01 : f32
    %54 = vector.broadcast %cst_23 : f32 to vector<1x8x128xf32>
    %55 = arith.mulf %53, %54 : vector<1x8x128xf32>
    %56 = math.exp %55 : vector<1x8x128xf32>
    %cst_24 = arith.constant dense<0.000000e+00> : vector<1x8xf32>
    %57 = vector.multi_reduction <add>, %56, %cst_24 [2] : vector<1x8x128xf32> to vector<1x8xf32>
    %58 = vector.shape_cast %57 : vector<1x8xf32> to vector<1x8x1xf32>
    %cst_25 = arith.constant -1.000000e-01 : f32
    %59 = vector.broadcast %cst_25 : f32 to vector<1x8x128xf32>
    %60 = arith.subf %10, %59 : vector<1x8x128xf32>
    %61 = arith.mulf %60, %60 : vector<1x8x128xf32>
    %cst_26 = arith.constant -5.000000e+01 : f32
    %62 = vector.broadcast %cst_26 : f32 to vector<1x8x128xf32>
    %63 = arith.mulf %61, %62 : vector<1x8x128xf32>
    %64 = math.exp %63 : vector<1x8x128xf32>
    %cst_27 = arith.constant dense<0.000000e+00> : vector<1x8xf32>
    %65 = vector.multi_reduction <add>, %64, %cst_27 [2] : vector<1x8x128xf32> to vector<1x8xf32>
    %66 = vector.shape_cast %65 : vector<1x8xf32> to vector<1x8x1xf32>
    %cst_28 = arith.constant -3.000000e-01 : f32
    %67 = vector.broadcast %cst_28 : f32 to vector<1x8x128xf32>
    %68 = arith.subf %10, %67 : vector<1x8x128xf32>
    %69 = arith.mulf %68, %68 : vector<1x8x128xf32>
    %cst_29 = arith.constant -5.000000e+01 : f32
    %70 = vector.broadcast %cst_29 : f32 to vector<1x8x128xf32>
    %71 = arith.mulf %69, %70 : vector<1x8x128xf32>
    %72 = math.exp %71 : vector<1x8x128xf32>
    %cst_30 = arith.constant dense<0.000000e+00> : vector<1x8xf32>
    %73 = vector.multi_reduction <add>, %72, %cst_30 [2] : vector<1x8x128xf32> to vector<1x8xf32>
    %74 = vector.shape_cast %73 : vector<1x8xf32> to vector<1x8x1xf32>
    %cst_31 = arith.constant -5.000000e-01 : f32
    %75 = vector.broadcast %cst_31 : f32 to vector<1x8x128xf32>
    %76 = arith.subf %10, %75 : vector<1x8x128xf32>
    %77 = arith.mulf %76, %76 : vector<1x8x128xf32>
    %cst_32 = arith.constant -5.000000e+01 : f32
    %78 = vector.broadcast %cst_32 : f32 to vector<1x8x128xf32>
    %79 = arith.mulf %77, %78 : vector<1x8x128xf32>
    %80 = math.exp %79 : vector<1x8x128xf32>
    %cst_33 = arith.constant dense<0.000000e+00> : vector<1x8xf32>
    %81 = vector.multi_reduction <add>, %80, %cst_33 [2] : vector<1x8x128xf32> to vector<1x8xf32>
    %82 = vector.shape_cast %81 : vector<1x8xf32> to vector<1x8x1xf32>
    %cst_34 = arith.constant -0.699999988 : f32
    %83 = vector.broadcast %cst_34 : f32 to vector<1x8x128xf32>
    %84 = arith.subf %10, %83 : vector<1x8x128xf32>
    %85 = arith.mulf %84, %84 : vector<1x8x128xf32>
    %cst_35 = arith.constant -5.000000e+01 : f32
    %86 = vector.broadcast %cst_35 : f32 to vector<1x8x128xf32>
    %87 = arith.mulf %85, %86 : vector<1x8x128xf32>
    %88 = math.exp %87 : vector<1x8x128xf32>
    %cst_36 = arith.constant dense<0.000000e+00> : vector<1x8xf32>
    %89 = vector.multi_reduction <add>, %88, %cst_36 [2] : vector<1x8x128xf32> to vector<1x8xf32>
    %90 = vector.shape_cast %89 : vector<1x8xf32> to vector<1x8x1xf32>
    %cst_37 = arith.constant -0.899999976 : f32
    %91 = vector.broadcast %cst_37 : f32 to vector<1x8x128xf32>
    %92 = arith.subf %10, %91 : vector<1x8x128xf32>
    %93 = arith.mulf %92, %92 : vector<1x8x128xf32>
    %cst_38 = arith.constant -5.000000e+01 : f32
    %94 = vector.broadcast %cst_38 : f32 to vector<1x8x128xf32>
    %95 = arith.mulf %93, %94 : vector<1x8x128xf32>
    %96 = math.exp %95 : vector<1x8x128xf32>
    %cst_39 = arith.constant dense<0.000000e+00> : vector<1x8xf32>
    %97 = vector.multi_reduction <add>, %96, %cst_39 [2] : vector<1x8x128xf32> to vector<1x8xf32>
    %98 = vector.shape_cast %97 : vector<1x8xf32> to vector<1x8x1xf32>
    %cst_40 = arith.constant 0.000000e+00 : f32
    %99 = vector.broadcast %cst_40 : f32 to vector<1x8x117xf32>
    %c0_41 = arith.constant 0 : index
    %c0_42 = arith.constant 0 : index
    %c0_43 = arith.constant 0 : index
    %100 = vector.load %arg6[%c0_41, %c0_42, %c0_43] : memref<1x8x128xf32, #tpu.memory_space<vmem>>, vector<1x8x128xf32>
    %101 = tpu.concatenate %18, %26, %34, %42, %50, %58, %66, %74, %82, %90, %98, %99 in 2 : vector<1x8x1xf32>, vector<1x8x1xf32>, vector<1x8x1xf32>, vector<1x8x1xf32>, vector<1x8x1xf32>, vector<1x8x1xf32>, vector<1x8x1xf32>, vector<1x8x1xf32>, vector<1x8x1xf32>, vector<1x8x1xf32>, vector<1x8x1xf32>, vector<1x8x117xf32> -> vector<1x8x128xf32>
    %102 = arith.addf %100, %101 : vector<1x8x128xf32>
    %c0_44 = arith.constant 0 : index
    %c0_45 = arith.constant 0 : index
    %c0_46 = arith.constant 0 : index
    %103 = vector.load %arg6[%c0_44, %c0_45, %c0_46] : memref<1x8x128xf32, #tpu.memory_space<vmem>>, vector<1x8x128xf32>
    tpu.vector_store %arg6[%c0_44, %c0_45, %c0_46], %102 {strides = array<i32>} : memref<1x8x128xf32, #tpu.memory_space<vmem>>, vector<1x8x128xf32>,
    %c0_i32_47 = arith.constant 0 : i32
    %104 = arith.cmpi eq, %arg1, %c0_i32_47 : i32
    %105 = arith.extui %104 : i1 to i32
    %c0_i32_48 = arith.constant 0 : i32
    %106 = arith.cmpi ne, %105, %c0_i32_48 : i32
    scf.if %106 {
      %c0_49 = arith.constant 0 : index
      %c0_50 = arith.constant 0 : index
      %c0_51 = arith.constant 0 : index
      %107 = vector.load %arg3[%c0_49, %c0_50, %c0_51] : memref<1x8x1xf32, #tpu.memory_space<vmem>>, vector<1x8x1xf32>
      %c0_52 = arith.constant 0 : index
      %c0_53 = arith.constant 0 : index
      %c0_54 = arith.constant 0 : index
      %108 = vector.load %arg6[%c0_52, %c0_53, %c0_54] : memref<1x8x128xf32, #tpu.memory_space<vmem>>, vector<1x8x128xf32>
      %cst_55 = arith.constant 1.000000e-10 : f32
      %109 = vector.broadcast %cst_55 : f32 to vector<1x8x128xf32>
      %110 = arith.maximumf %108, %109 : vector<1x8x128xf32>
      %111 = math.log %110 : vector<1x8x128xf32>
      %cst_56 = arith.constant 0.00999999977 : f32
      %112 = vector.broadcast %cst_56 : f32 to vector<1x8x128xf32>
      %113 = arith.mulf %111, %112 : vector<1x8x128xf32>
      %114 = vector.broadcast %107 : vector<1x8x1xf32> to vector<1x8x128xf32>
      %115 = arith.mulf %113, %114 : vector<1x8x128xf32>
      %cst_57 = arith.constant dense<0.000000e+00> : vector<1x128xf32>
      %116 = vector.multi_reduction <add>, %115, %cst_57 [1] : vector<1x8x128xf32> to vector<1x128xf32>
      %117 = vector.shape_cast %116 : vector<1x128xf32> to vector<1x1x128xf32>
      %c0_58 = arith.constant 0 : index
      %c0_59 = arith.constant 0 : index
      %c0_60 = arith.constant 0 : index
      %118 = vector.load %arg5[%c0_58, %c0_59, %c0_60] : memref<1x1x128xf32, #tpu.memory_space<vmem>>, vector<1x1x128xf32>
      tpu.vector_store %arg5[%c0_58, %c0_59, %c0_60], %117 {strides = array<i32>} : memref<1x1x128xf32, #tpu.memory_space<vmem>>, vector<1x1x128xf32>,
    } else {
    }
    return
  }
  func.func @transform_0(%arg0: i32, %arg1: i32) -> (i32, i32, i32) {
    %c0_i32 = arith.constant 0 : i32
    %c0_i32_0 = arith.constant 0 : i32
    return %arg0, %c0_i32, %arg1 : i32, i32, i32
  }
  func.func @transform_1(%arg0: i32, %arg1: i32) -> (i32, i32, i32) {
    %c0_i32 = arith.constant 0 : i32
    %c0_i32_0 = arith.constant 0 : i32
    %c0_i32_1 = arith.constant 0 : i32
    return %arg0, %c0_i32, %c0_i32_0 : i32, i32, i32
  }
  func.func @transform_2(%arg0: i32, %arg1: i32) -> (i32, i32, i32) {
    %c0_i32 = arith.constant 0 : i32
    %c0_i32_0 = arith.constant 0 : i32
    return %arg0, %c0_i32, %arg1 : i32, i32, i32
  }
  func.func @transform_3(%arg0: i32, %arg1: i32) -> (i32, i32, i32) {
    %c0_i32 = arith.constant 0 : i32
    %c0_i32_0 = arith.constant 0 : i32
    %c0_i32_1 = arith.constant 0 : i32
    return %arg0, %c0_i32, %c0_i32_0 : i32, i32, i32
  }
}

</mosaic_0001>

<bundles_post_ra>
// kernel: tpu_custom_call.1
= control target key start
LH: loop header
LB: loop body
LE: loop exit
PB: predicated region body
PF: predicated region fallthrough
CT: control target
= control target key end

     0   :  { %8 = vsyncpa [#allocation4], 0  ;;  %s803_s0 = inlined_call_operand.vmem [shape: f32[2,8,128], index: 0, kind: input, shape index: {}]   ;;  %s804_s1 = inlined_call_operand.vmem [shape: f32[2,8,1], index: 1, kind: input, shape index: {}]   ;;  %s805_s2 = inlined_call_operand.vmem [shape: f32[2,1,128], index: 2, kind: input, shape index: {}]   ;;  %s806_s3 = inlined_call_operand.hbm [shape: f32[2,1,128], index: 3, kind: output, shape index: {}]  }
   0x1   :  { %10 = vsyncpa [#allocation4 + $0x1], 0  ;;  %s677_s12 = smov 0   ;;  %s679_s13 = smov 0  }
   0x2   :  { %s681_s14 = smov 0   ;;  %s683_s15 = smov 0  }
   0x3   :  { %s685_s16 = smov 0   ;;  %s687_s17 = smov 0  }
   0x4 LB: > { %s472_s18 = sadd.s32 4294967295, %s653_s17   ;;  %s473_s19 = sadd.s32 4294967294, %s653_s17   ;;  %s653_s17 = sphi %s687_s17, %s16_s17   ;;  %s649_s16 = sphi %s685_s16, %s813_s16   ;;  %s645_s15 = sphi %s683_s15, %s812_s15   ;;  %s641_s14 = sphi %s681_s14, %s811_s14   ;;  %s637_s13 = sphi %s679_s13, %s810_s13   ;;  %s633_s12 = sphi %s677_s12, %s809_s12  }
   0x5   : > { %s28_s20 = sadd.s32 1, %s649_s16  ;;  %s117_s21 = sadd.s32 1, %s641_s14 }
   0x6   : > { %p30_p0 = scmp.ge.s32.totalorder %s28_s20, 2  ;;  %p127_p1 = scmp.ne.s32.totalorder %s641_s14, %s637_s13 }
   0x7   : > { %p128_p2 = scmp.eq.s32.totalorder %s472_s18, 1  ;;  %p133_p3 = scmp.ne.s32.totalorder %s637_s13, %s633_s12 }
   0x8   : > { %s815_s20 = smov (%p30_p0, %s28_s20), 0  ;;  %p134_p5 = scmp.eq.s32.totalorder %s473_s19, 1 }
   0x9   : > { %p717_p4 = por %p128_p2, %p127_p1  ;;  %s114_s23 = ssub.s32 %s649_s16, %s815_s20 }
   0xa   : > { %p476_p6 = scmp.ge.s32.totalorder %s653_s17, 1  ;;  %p115_p7 = scmp.eq.s32.totalorder %s114_s23, 0 }
   0xb   : > { %p724_p8 = por %p134_p5, %p133_p3  ;;  %p178_p9 = scmp.lt.s32.totalorder %s653_s17, 3 }
   0xc   : > { %s730_s25 = scalar_select %p115_p7, %s641_s14, %s117_s21  }
   0xd   : > { %p179_p10 = pnand %p476_p6, %p178_p9 }
   0xe   : > { %p213_p11 = scmp.lt.s32.totalorder (!%p179_p10), %s645_s15, 1  ;;  %v239_v0 = vlaneseq (!%p179_p10)  ;;  %v655_v1 = vmov (!%p179_p10), 0   ;;  %vm323_vm2 = vcmask (!%p179_p10), 7168   ;;  %vm325_vm3 = vcmask (!%p179_p10), 15360   ;;  %s211_s10 = sand.u32 (!%p179_p10), 1, %s637_s13  }
   0xf   : > { %182 = sbr.rel (%p179_p10) target bundleno = 260 (0x104), region = 32  ;;  %549 = vset.pattern.permute.xlu1 (!%p179_p10), %v655_v1  ;;  %550 = vset.pattern.permute.xlu0 (!%p179_p10), %v655_v1  ;;  %vm327_vm4 = vcmask (!%p179_p10), 23552   ;;  %vm329_vm5 = vcmask (!%p179_p10), 31744   ;;  %vm331_vm6 = vcmask (!%p179_p10), 39936   ;;  %vm333_vm7 = vcmask (!%p179_p10), 48128   ;;  %s490_s11 = sshll.u32 (!%p179_p10), %s645_s15, 4 }
  0x10   : > { %v240_v2 = vshrl.u32 (!%p179_p10), %v239_v0, 7  ;;  %vm335_vm8 = vcmask (!%p179_p10), 56320   ;;  %vm337_vm9 = vcmask (!%p179_p10), 64512   ;;  %vm339_vm10 = vcmask (!%p179_p10), 72704   ;;  %s212_s18 = scalar_lea.vmem (!%p179_p10), [#allocation3], %s211_s10 }
  0x11   : > { %vm341_vm11 = vcmask (!%p179_p10), 80896   ;;  %vm343_vm12 = vcmask (!%p179_p10), 89088   ;;  %s382_s19 = sshll.u32 (!%p179_p10), %s212_s18, 4  ;;  %s758_s19 = int_to_ptr.vmem [resolvable:$true] %s382_s19 }
  0x12   : > { %v241_v3 = vsub.s32 (!%p179_p10), 0, %v240_v2  ;;  %s575_s28 = scalar_lea.vmem (!%p179_p10), %s758_s19, 16 }
  0x13   : > { %p576_p12 = scmp.ne.s32.totalorder (!%p179_p10), %s758_s19, %s575_s28 }
  0x15   : > { %p577_p13 = pnand (!%p179_p10), %p576_p12, %p717_p4 }
  0x16   : > { %s734_s26 = scalar_select %p213_p11, %s645_s15, 1 }
  0x17   : > { %p578_p0 = pneg %p577_p13  ;;  %s656_s15 = smov [#allocation3]  }
  0x18   : > { %s477_s27 = sshll.u32 %s734_s26, 3  ;;  %s229_s30 = scalar_lea.vmem %s805_s2, %s734_s26 }
  0x19   : > { %s219_s6 = scalar_lea.vmem %s803_s0, %s477_s27  ;;  %v235_v4 = vld [vmem:[%s229_s30] sm:$0x1]  ;;  %s223_s9 = scalar_lea.vmem %s804_s1, %s477_s27 }
  0x1a   : > { %vm236_vm0 = vcmp.gt.f32.partialorder %v235_v4, 0.0  ;;  %v237_v6 = vld [vmem:[%s219_s6] sm:$0xff]  ;;  %s756_s26 = scalar_lea.hbm %s806_s3, %s490_s11  ;;  %s370_s27 = scalar_lea.sflag [#allocation4], %s211_s10 }
  0x1b   : > { %v238_v5 = vsel %vm236_vm0, 1, %v655_v1  ;;  %v350_v0 = vld [vmem:[%s223_s9] sm:$0xff]  ;;  %s579_s29 = sshll.u32 %s656_s15, 4  ;;  %s580_s29 = int_to_ptr.vmem [resolvable:$false] %s579_s29 }
  0x1c   : > { %v242_v7 = vrot.slane %v238_v5, %v241_v3  ;;  %s581_s30 = scalar_lea.vmem %s580_s29, 32  ;;  %p582_p1 = scmp.lt.s32.totalorder %s758_s19, %s580_s29 }
  0x1d   : > { %p583_p2 = scmp.lt.s32.totalorder %s581_s30, %s575_s28 }
  0x1e   : > { %vm243_vm1 = vcmp.eq.s32.totalorder %v242_v7, 1 }
  0x1f   : > { %v244_v8 = vsel %vm243_vm1, %v237_v6, 3.0  ;;  %p584_p3 = por %p583_p2, %p582_p1 }
  0x20   : > { %v479_v9 = vadd.f32 -1.0, %v244_v8  ;;  %v481_v10 = vadd.f32 -0.7, %v244_v8  ;;  %v480_v11 = vadd.f32 -0.9, %v244_v8  ;;  %v482_v12 = vadd.f32 -0.5, %v244_v8 }
  0x21   : > { %v483_v13 = vadd.f32 -0.3, %v244_v8  ;;  %v484_v14 = vadd.f32 -0.1, %v244_v8  ;;  %v485_v15 = vadd.f32 0.1, %v244_v8  ;;  %p585_p5 = pnand %p584_p3, %p578_p0 }
  0x22   : > { %v246_v16 = vmul.f32 %v479_v9, %v479_v9  ;;  %v260_v17 = vmul.f32 %v481_v10, %v481_v10  ;;  %v253_v18 = vmul.f32 %v480_v11, %v480_v11  ;;  %v267_v19 = vmul.f32 %v482_v12, %v482_v12 }
  0x23   : > { %v274_v20 = vmul.f32 %v483_v13, %v483_v13  ;;  %v281_v21 = vmul.f32 %v484_v14, %v484_v14  ;;  %v486_v22 = vadd.f32 0.3, %v244_v8  ;;  %v288_v28 = vmul.f32 %v485_v15, %v485_v15 }
  0x24   : > { %v247_v23 = vmul.f32 -500000.0, %v246_v16  ;;  %v261_v24 = vmul.f32 -50.0, %v260_v17  ;;  %v254_v25 = vmul.f32 -50.0, %v253_v18  ;;  %v268_v26 = vmul.f32 -50.0, %v267_v19 }
  0x25   : > { %v275_v27 = vmul.f32 -50.0, %v274_v20  ;;  %v282_v33 = vmul.f32 -50.0, %v281_v21  ;;  %v295_v34 = vmul.f32 %v486_v22, %v486_v22  ;;  %v487_v35 = vadd.f32 0.5, %v244_v8 }
  0x26   : > { %v248_v29 = vmul.f32 1.442695, %v247_v23  ;;  %v262_v30 = vmul.f32 1.442695, %v261_v24  ;;  %v255_v31 = vmul.f32 1.442695, %v254_v25 }
  0x27   : > { %v269_v32 = vmul.f32 1.442695, %v268_v26  ;;  %v289_v36 = vmul.f32 -50.0, %v288_v28  ;;  %v488_v37 = vadd.f32 0.7, %v244_v8  ;;  %v302_v39 = vmul.f32 %v487_v35, %v487_v35 }
  0x28   : > { %551 = vpow2.f32 %v248_v29  ;;  %v276_v38 = vmul.f32 1.442695, %v275_v27  ;;  %v489_v40 = vadd.f32 0.9, %v244_v8  ;;  %v283_v41 = vmul.f32 1.442695, %v282_v33 }
  0x29   : > { %553 = vpow2.f32 %v262_v30  ;;  %v296_v42 = vmul.f32 -50.0, %v295_v34  ;;  %v309_v43 = vmul.f32 %v488_v37, %v488_v37  ;;  %v290_v44 = vmul.f32 1.442695, %v289_v36 }
  0x2a   : > { %555 = vpow2.f32 %v255_v31  ;;  %v303_v45 = vmul.f32 -50.0, %v302_v39  ;;  %v316_v46 = vmul.f32 %v489_v40, %v489_v40 }
  0x2b   : > { %557 = vpow2.f32 %v269_v32  ;;  %v297_v47 = vmul.f32 1.442695, %v296_v42  ;;  %v310_v48 = vmul.f32 -50.0, %v309_v43 }
  0x2c   : > { %559 = vpow2.f32 %v276_v38  ;;  %v304_v50 = vmul.f32 1.442695, %v303_v45  ;;  %v317_v51 = vmul.f32 -50.0, %v316_v46 }
  0x2d   : > { %561 = vpow2.f32 %v283_v41  ;;  %v311_v53 = vmul.f32 1.442695, %v310_v48 }
  0x2e   : > { %563 = vpow2.f32 %v290_v44  ;;  %v318_v56 = vmul.f32 1.442695, %v317_v51 }
  0x2f   : > { %565 = vpow2.f32 %v297_v47 }
  0x30   : > { %567 = vpow2.f32 %v304_v50 }
  0x31   : > { %569 = vpow2.f32 %v311_v53 }
  0x32   : > { %v552_v49 = vpop.eup %551  ;;  %571 = vpow2.f32 %v318_v56 }
  0x33   : > { %v554_v52 = vpop.eup %553  ;;  %250 = vadd.xlane.f32.xlu0 %v552_v49 }
  0x34   : > { %v556_v54 = vpop.eup %555  ;;  %264 = vadd.xlane.f32.xlu1 %v554_v52 }
  0x35   : > { %v558_v55 = vpop.eup %557 }
  0x36   : > { %v560_v57 = vpop.eup %559 }
  0x37   : > { %257 = vadd.xlane.f32.xlu0 %v556_v54  ;;  %v562_v58 = vpop.eup %561 }
  0x38   : > { %271 = vadd.xlane.f32.xlu1 %v558_v55  ;;  %v564_v59 = vpop.eup %563 }
  0x39   : > { %v566_v60 = vpop.eup %565 }
  0x3a   : > { %v568_v61 = vpop.eup %567 }
  0x3b   : > { %278 = vadd.xlane.f32.xlu0 %v560_v57  ;;  %v570_v62 = vpop.eup %569 }
  0x3c   : > { %285 = vadd.xlane.f32.xlu1 %v562_v58  ;;  %v572_v63 = vpop.eup %571 }
  0x3f   : > { %292 = vadd.xlane.f32.xlu0 %v564_v59 }
  0x40   : > { %299 = vadd.xlane.f32.xlu1 %v566_v60 }
  0x43   : > { %306 = vadd.xlane.f32.xlu0 %v568_v61 }
  0x44   : > { %313 = vadd.xlane.f32.xlu1 %v570_v62 }
  0x47   : > { %320 = vadd.xlane.f32.xlu0 %v572_v63 }
  0x55   : > { %358 = vperm.xlu1 %549, %v350_v0  }
  0xc0   : > { %v251_v1 = vpop.xlane.xlu0 %250 }
  0xc1   : > { %v265_v2 = vpop.xlane.xlu1 %264 }
  0xc4   : > { %v258_v3 = vpop.xlane.xlu0 %257 }
  0xc5   : > { %v324_v4 = vsel %vm323_vm2, %v251_v1, %v258_v3  ;;  %v272_v5 = vpop.xlane.xlu1 %271 }
  0xc6   : > { %v326_v6 = vsel %vm325_vm3, %v324_v4, %v265_v2 }
  0xc7   : > { %v328_v7 = vsel %vm327_vm4, %v326_v6, %v272_v5 }
  0xc8   : > { %v279_v8 = vpop.xlane.xlu0 %278 }
  0xc9   : > { %v330_v9 = vsel %vm329_vm5, %v328_v7, %v279_v8  ;;  %v286_v10 = vpop.xlane.xlu1 %285 }
  0xca   : > { %v332_v11 = vsel %vm331_vm6, %v330_v9, %v286_v10 }
  0xcc   : > { %v293_v12 = vpop.xlane.xlu0 %292 }
  0xcd   : > { %v334_v13 = vsel %vm333_vm7, %v332_v11, %v293_v12  ;;  %v300_v14 = vpop.xlane.xlu1 %299 }
  0xce   : > { %v336_v15 = vsel %vm335_vm8, %v334_v13, %v300_v14 }
  0xd0   : > { %v307_v16 = vpop.xlane.xlu0 %306 }
  0xd1   : > { %v338_v17 = vsel %vm337_vm9, %v336_v15, %v307_v16  ;;  %v314_v18 = vpop.xlane.xlu1 %313 }
  0xd2   : > { %v340_v19 = vsel %vm339_vm10, %v338_v17, %v314_v18 }
  0xd4   : > { %v321_v20 = vpop.xlane.xlu0 %320 }
  0xd5   : > { %v342_v21 = vsel %vm341_vm11, %v340_v19, %v321_v20  ;;  %v359_v26 = vpop.permute.xlu1 %358 }
  0xd6   : > { %v344_v22 = vsel %vm343_vm12, %v342_v21, 0.0 }
  0xd7   : > { %v352_v23 = vmax.f32 %v344_v22, 1e-10 }
  0xd9   : > { %573 = vlog2.f32 %v352_v23 }
  0xe3   : > { %v574_v24 = vpop.eup %573 }
  0xe4   : > { %v354_v25 = vmul.f32 0.6931472, %v574_v24 }
  0xe6   : > { %v355_v27 = vmul.f32 0.01, %v354_v25 }
  0xe8   : > { %v361_v28 = vmul.f32 %v359_v26, %v355_v27 }
  0xea   : > { %v362_v29 = vrot.slane %v361_v28, 4 }
  0xec   : > { %v363_v30 = vadd.f32 %v362_v29, %v361_v28 }
  0xee   : > { %v364_v31 = vrot.slane %v363_v30, 2 }
  0xf0   : > { %v365_v32 = vadd.f32 %v364_v31, %v363_v30 }
  0xf2   : > { %v366_v33 = vrot.slane %v365_v32, 1 }
  0xf4   : > { %v367_v34 = vadd.f32 %v366_v33, %v365_v32 }
  0xf6   : > { %368 = vst [vmem:[%s212_s18] sm:$0x1] %v367_v34 }
  0xf7   : > { %588 = shalt.err (!%p585_p5)
}
  0xf8   : > { %s589_s4 = scalar_lea.hbm %s756_s26, 16  ;;  %s593_s7 = scalar_lea.hbm %s806_s3, 32 }
  0xf9   : > { %p590_p6 = scmp.ne.s32.totalorder %s756_s26, %s589_s4  ;;  %p594_p10 = scmp.lt.u32.totalorder %s756_s26, %s806_s3 }
  0xfa   : > { %p595_p11 = scmp.lt.u32.totalorder %s593_s7, %s589_s4  ;;  %p597_p13 = scmp.lt.u32.totalorder %s589_s4, %s756_s26 }
  0xfb   : > { %p591_p7 = pnand %p590_p6, %p717_p4 }
  0xfc   : > { %p596_p12 = por %p595_p11, %p594_p10 }
  0xfd   : > { %p592_p9 = pneg %p591_p7 }
  0xfe   : > { %p598_p0 = por %p597_p13, %p596_p12 }
 0x100   : > { %p599_p1 = pnand %p598_p0, %p592_p9 }
 0x102   : > { %602 = shalt.err (!%p599_p1)
}
 0x103   : > { %493 = dma.vmem_to_hbm [thread:$0]  (%p717_p4), %s758_s19, 16, %s756_s26, %s370_s27  }
 0x104 PF: > { %p499_p2 = scmp.ge.s32.totalorder %s653_s17, 2  ;;  %s394_s10 = sand.u32 1, %s633_s12  }
 0x105   : > { %s395_s11 = scalar_lea.sflag [#allocation4], %s394_s10 }
 0x106   : > { %p496_p3 = pnand %p499_p2, %p724_p8 }
 0x108   : > { %628 = dma.done.wait (!%p496_p3), %s395_s11, 16  }
 0x109   : > { %630 = vsyncadd (!%p496_p3), %s395_s11, 4294967280  ;;  %s16_s17 = sadd.s32 1, %s653_s17   ;;  %s809_s12 = smov %s637_s13 }
 0x10a   : > { %p13_p5 = scmp.ge.s32.totalorder %s16_s17, 4   ;;  %s810_s13 = smov %s641_s14 }
 0x10b   : > { %s811_s14 = smov %s730_s25  ;;  %s812_s15 = smov %s649_s16 }
 0x10c   : > { %s813_s16 = smov %s815_s20  ;;  %15 = sbr.rel (!%p13_p5) target bundleno = 4 (0x4), region = 81 }
 0x113   :  { %399 = vsyncpa [#allocation4], 1 }
 0x114   :  { %401 = vsyncpa [#allocation4 + $0x1], 1 }

</bundles_post_ra>
